<compile_context>
chip_gen: v7x
topology: tpu7x:2x2x1
jax: 0.10.0
libtpu: 0.0.40
codegen_flags: <defaults>
</compile_context>

<pallas_src>
import functools
import math

import jax
import jax.numpy as jnp
from jax.experimental import pallas as pl
from jax.experimental.pallas import tpu as pltpu


def encoder_cnn_kernel(x_ref,
                       w1_ref, b1_ref,
                       w2_ref, b2_ref,
                       w3_ref, b3_ref,
                       wh_ref, bh_ref,
                       out_ref, *, seq_len, carry_dtype):
    rows = x_ref.shape[0]

    # Per-sequence boundary masks on the flattened row index (computed once).
    t = jax.lax.broadcasted_iota(jnp.int32, (rows, 1), 0) % seq_len
    not_first = t != 0              # rows whose "previous" row is a real neighbor
    not_last = t != (seq_len - 1)   # rows whose "next" row is a real neighbor

    def conv_k3(h, w_ref, b_ref):
        # Shift-after-matmul:  out[r] = h[r-1]@W0 + h[r]@W1 + h[r+1]@W2.
        # Rolling the f32 tap outputs (XLU slot) avoids any lane-misaligned
        # concatenate and keeps elementwise work in f32; h stays bf16 for the MXU.
        out = jnp.dot(h, w_ref[1], preferred_element_type=jnp.float32) + b_ref[...]
        y_prev = jnp.dot(h, w_ref[0], preferred_element_type=jnp.float32)
        out = out + jnp.where(not_first, pltpu.roll(y_prev, shift=1, axis=0), 0.0)
        y_next = jnp.dot(h, w_ref[2], preferred_element_type=jnp.float32)
        out = out + jnp.where(not_last, pltpu.roll(y_next, shift=rows - 1, axis=0), 0.0)
        return out.astype(carry_dtype)

    h = x_ref[...].astype(carry_dtype)
    h = conv_k3(h, w1_ref, b1_ref)   # (rows, 32)
    h = conv_k3(h, w2_ref, b2_ref)   # (rows, 64)
    h = conv_k3(h, w3_ref, b3_ref)   # (rows, 128)

    # Fused mean|logvar head, zero-padded to a 128-lane multiple (unmasked store).
    head = jnp.dot(h, wh_ref[...], preferred_element_type=jnp.float32) + bh_ref[...]
    out_ref[...] = head.astype(out_ref.dtype)


@functools.partial(jax.jit, static_argnames=("tb", "target_rows"))
def encoder_cnn_forward(x, params, *, tb=None, target_rows=4096):
    """x: (B, L, C_in) f32.  Returns (mean, logvar), each (B, L, latent) f32."""
    B, L, C_in = x.shape
    latent = params["wm"].shape[1]
    head_n = pl.cdiv(2 * latent, 128) * 128   # lane-dense (>=128) head width

    # ---- batch-tile selection ----------------------------------------------
    if tb is None:
        # ~4096 flattened rows/step amortizes the ~0.35us grid-step overhead;
        # the per-step footprint (~3.5 KB/row) stays well under v7x's 64 MiB VMEM.
        tb = max(1, min(B, max(1, target_rows // max(L, 1))))
        # keep >= 2 grid steps when B allows, so the ("parallel",) batch axis
        # shards over both v7x TensorCores and the pipeline has work to overlap.
        while tb > 1 and pl.cdiv(B, tb) < 2:
            tb = max(1, tb // 2)
    # sublane-align the flattened (tb*L, .) blocks
    align = 8 // math.gcd(L, 8)
    tb = max(align, (tb // align) * align)
    grid_b = pl.cdiv(B, tb)
    b_pad = grid_b * tb
    if b_pad != B:
        x = jnp.pad(x, ((0, b_pad - B), (0, 0), (0, 0)))
    # flatten outside the kernel: one contiguous DMA per block, no in-kernel reshape
    x_flat = x.reshape(b_pad * L, C_in)
    rows = tb * L

    # ---- host-side weight packing ------------------------------------------
    # conv weights stay (3, C_in, C_out) (tap 0 == "previous" sample), bf16 for MXU
    w1 = params["w1"].astype(jnp.bfloat16)
    w2 = params["w2"].astype(jnp.bfloat16)
    w3 = params["w3"].astype(jnp.bfloat16)
    b1 = params["b1"].astype(jnp.float32)
    b2 = params["b2"].astype(jnp.float32)
    b3 = params["b3"].astype(jnp.float32)
    # fused mean|logvar head, zero-padded so the output block is 128-lane dense
    wh = jnp.concatenate([params["wm"], params["wv"]], axis=1)
    bh = jnp.concatenate([params["bm"], params["bv"]], axis=1)
    wh = jnp.pad(wh, ((0, 0), (0, head_n - 2 * latent))).astype(jnp.bfloat16)
    bh = jnp.pad(bh, ((0, 0), (0, head_n - 2 * latent))).astype(jnp.float32)

    weight_args = (w1, b1, w2, b2, w3, b3, wh, bh)

    def _rep_spec(a):
        zeros = (0,) * a.ndim
        return pl.BlockSpec(a.shape, lambda b, _z=zeros: _z)

    in_specs = [pl.BlockSpec((rows, C_in), lambda b: (b, 0))]
    in_specs += [_rep_spec(a) for a in weight_args]
    out_spec = pl.BlockSpec((rows, head_n), lambda b: (b, 0))

    kernel = functools.partial(encoder_cnn_kernel, seq_len=L,
                               carry_dtype=jnp.bfloat16)

    out = pl.pallas_call(
        kernel,
        out_shape=jax.ShapeDtypeStruct((b_pad * L, head_n), jnp.float32),
        grid_spec=pl.GridSpec(
            grid=(grid_b,),
            in_specs=in_specs,
            out_specs=out_spec,
        ),
        compiler_params=pltpu.CompilerParams(
            dimension_semantics=("parallel",),
            # > v5e's 16 MiB scoped default, < v7x's 64 MiB physical VMEM
            vmem_limit_bytes=48 * 1024 * 1024,
        ),
    )(x_flat, *weight_args)

    out = out.reshape(b_pad, L, head_n)[:B]
    return out[..., :latent], out[..., latent:2 * latent]


def init_params(key, input_size, latent_dim):
    """Deterministic synthetic parameters.

    Conv weights are stored as (3, C_in, C_out), i.e. PyTorch's
    (C_out, C_in, 3) permuted to (2, 1, 0), so each tap is a channels-last
    matmul and tap k=0 multiplies the "previous" sample.
    """
    keys = jax.random.split(key, 10)

    def u(k, shape, fan_in):
        bound = 1.0 / jnp.sqrt(fan_in)
        return jax.random.uniform(k, shape, jnp.float32, -bound, bound)

    return {
        # conv1: Conv1d(input_size, 32, k=3, pad=1)
        "w1": u(keys[0], (3, input_size, 32), input_size * 3),
        "b1": u(keys[1], (1, 32), input_size * 3),
        # conv2: Conv1d(32, 64, k=3, pad=1)
        "w2": u(keys[2], (3, 32, 64), 32 * 3),
        "b2": u(keys[3], (1, 64), 32 * 3),
        # conv3: Conv1d(64, 128, k=3, pad=1)
        "w3": u(keys[4], (3, 64, 128), 64 * 3),
        "b3": u(keys[5], (1, 128), 64 * 3),
        # fc_mean / fc_logvar: Linear(128, latent_dim), stored as (in, out)
        "wm": u(keys[6], (128, latent_dim), 128),
        "bm": u(keys[7], (1, latent_dim), 128),
        "wv": u(keys[8], (128, latent_dim), 128),
        "bv": u(keys[9], (1, latent_dim), 128),
    }


def _reference(x, p):
    """Plain-JAX reference matching PyTorch conv/linear semantics.

    Uses the same bf16-input / f32-accumulation matmul precision as the kernel
    so the tolerance check is meaningful."""
    def mm(a, w):
        return jnp.einsum("blc,cd->bld",
                          a.astype(jnp.bfloat16), w.astype(jnp.bfloat16),
                          preferred_element_type=jnp.float32)

    def conv(h, w, b):  # h: (B, L, C_in), w: (3, C_in, C_out)
        hp = jnp.pad(h, ((0, 0), (1, 1), (0, 0)))
        L = h.shape[1]
        out = b.astype(jnp.float32)
        for k in range(3):
            out = out + mm(hp[:, k:k + L, :], w[k])
        return out

    h = conv(x, p["w1"], p["b1"])
    h = conv(h, p["w2"], p["b2"])
    h = conv(h, p["w3"], p["b3"])
    mean = mm(h, p["wm"]) + p["bm"]
    logvar = mm(h, p["wv"]) + p["bv"]
    return mean, logvar


if __name__ == "__main__":
    B, L, INPUT_SIZE, LATENT_DIM = 2, 8, 4, 32

    key = jax.random.PRNGKey(0)
    k_x, k_p = jax.random.split(key)
    x = jax.random.normal(k_x, (B, L, INPUT_SIZE), jnp.float32)
    params = init_params(k_p, INPUT_SIZE, LATENT_DIM)

    mean, logvar = encoder_cnn_forward(x, params)
    jax.block_until_ready((mean, logvar))

    # correctness sanity check against plain-JAX reference (bf16-matched)
    mean_ref, logvar_ref = _reference(x, params)
    assert mean.shape == (B, L, LATENT_DIM) and logvar.shape == (B, L, LATENT_DIM)
    assert jnp.allclose(mean, mean_ref, atol=2e-2, rtol=2e-2)
    assert jnp.allclose(logvar, logvar_ref, atol=2e-2, rtol=2e-2)

    print("KERNEL_OK")
</pallas_src>

<mosaic_0001>
module attributes {stable_mosaic.version = 11 : i64} {
  func.func @encoder_cnn_kernel(%arg0: i32, %arg1: memref<8x4xf32, #tpu.memory_space<vmem>>, %arg2: memref<3x4x32xbf16, #tpu.memory_space<vmem>>, %arg3: memref<1x32xf32, #tpu.memory_space<vmem>>, %arg4: memref<3x32x64xbf16, #tpu.memory_space<vmem>>, %arg5: memref<1x64xf32, #tpu.memory_space<vmem>>, %arg6: memref<3x64x128xbf16, #tpu.memory_space<vmem>>, %arg7: memref<1x128xf32, #tpu.memory_space<vmem>>, %arg8: memref<128x128xbf16, #tpu.memory_space<vmem>>, %arg9: memref<1x128xf32, #tpu.memory_space<vmem>>, %arg10: memref<8x128xf32, #tpu.memory_space<vmem>>) attributes {dimension_semantics = [#tpu.dimension_semantics<parallel>], iteration_bounds = array<i64: 2>, scalar_prefetch = 0 : i64, scratch_operands = 0 : i64, tpu.core_type = #tpu.core_type<tc>, window_params = [{transform_indices = @transform_0, window_bounds = array<i64: 8, 4>}, {pipeline_mode = #tpu.pipeline_mode<synchronous>, transform_indices = @transform_1, window_bounds = array<i64: 3, 4, 32>}, {pipeline_mode = #tpu.pipeline_mode<synchronous>, transform_indices = @transform_2, window_bounds = array<i64: 1, 32>}, {pipeline_mode = #tpu.pipeline_mode<synchronous>, transform_indices = @transform_3, window_bounds = array<i64: 3, 32, 64>}, {pipeline_mode = #tpu.pipeline_mode<synchronous>, transform_indices = @transform_4, window_bounds = array<i64: 1, 64>}, {pipeline_mode = #tpu.pipeline_mode<synchronous>, transform_indices = @transform_5, window_bounds = array<i64: 3, 64, 128>}, {pipeline_mode = #tpu.pipeline_mode<synchronous>, transform_indices = @transform_6, window_bounds = array<i64: 1, 128>}, {pipeline_mode = #tpu.pipeline_mode<synchronous>, transform_indices = @transform_7, window_bounds = array<i64: 128, 128>}, {pipeline_mode = #tpu.pipeline_mode<synchronous>, transform_indices = @transform_8, window_bounds = array<i64: 1, 128>}, {transform_indices = @transform_9, window_bounds = array<i64: 8, 128>}]} {
    %0 = tpu.iota {dimensions = array<i32: 0>} : vector<8x1xi32>
    %c8_i32 = arith.constant 8 : i32
    %c0_i32 = arith.constant 0 : i32
    %1 = arith.cmpi eq, %c8_i32, %c0_i32 : i32
    %c1_i32 = arith.constant 1 : i32
    %2 = arith.select %1, %c1_i32, %c8_i32 : i32
    %3 = vector.broadcast %2 : i32 to vector<8x1xi32>
    %4 = arith.remsi %0, %3 : vector<8x1xi32>
    %c0_i32_0 = arith.constant 0 : i32
    %5 = vector.broadcast %c0_i32_0 : i32 to vector<8x1xi32>
    %6 = arith.cmpi ne, %4, %5 : vector<8x1xi32>
    %c0_i32_1 = arith.constant 0 : i32
    %7 = vector.broadcast %c0_i32_1 : i32 to vector<8x1xi32>
    %8 = arith.cmpi slt, %4, %7 : vector<8x1xi32>
    %c0_i32_2 = arith.constant 0 : i32
    %9 = arith.cmpi slt, %2, %c0_i32_2 : i32
    %10 = vector.broadcast %9 : i1 to vector<8x1xi1>
    %11 = vector.broadcast %10 : vector<8x1xi1> to vector<8x1xi1>
    %12 = arith.xori %8, %11 : vector<8x1xi1>
    %13 = arith.andi %12, %6 : vector<8x1xi1>
    %14 = vector.broadcast %2 : i32 to vector<8x1xi32>
    %15 = arith.addi %4, %14 : vector<8x1xi32>
    %16 = arith.select %13, %15, %4 : vector<8x1xi1>, vector<8x1xi32>
    %c0_i32_3 = arith.constant 0 : i32
    %17 = vector.broadcast %c0_i32_3 : i32 to vector<8x1xi32>
    %18 = arith.cmpi ne, %16, %17 : vector<8x1xi32>
    %c7_i32 = arith.constant 7 : i32
    %19 = vector.broadcast %c7_i32 : i32 to vector<8x1xi32>
    %20 = arith.cmpi ne, %16, %19 : vector<8x1xi32>
    %c0 = arith.constant 0 : index
    %c0_4 = arith.constant 0 : index
    %21 = vector.load %arg1[%c0, %c0_4] : memref<8x4xf32, #tpu.memory_space<vmem>>, vector<8x4xf32>
    %22 = arith.truncf %21 : vector<8x4xf32> to vector<8x4xbf16>
    %c1 = arith.constant 1 : index
    %c0_5 = arith.constant 0 : index
    %c0_6 = arith.constant 0 : index
    %23 = vector.load %arg2[%c1, %c0_5, %c0_6] : memref<3x4x32xbf16, #tpu.memory_space<vmem>>, vector<1x4x32xbf16>
    %24 = vector.shape_cast %23 : vector<1x4x32xbf16> to vector<4x32xbf16>
    %cst = arith.constant dense<0.000000e+00> : vector<8x32xf32>
    %25 = tpu.matmul %22, %24, %cst {dimension_numbers = #tpu.dot_dimension_numbers<[1], [0], [0], [1], [0, 0, 1, 1], [], []>} : vector<8x4xbf16>, vector<4x32xbf16>, vector<8x32xf32> -> vector<8x32xf32>
    %c0_7 = arith.constant 0 : index
    %c0_8 = arith.constant 0 : index
    %26 = vector.load %arg3[%c0_7, %c0_8] : memref<1x32xf32, #tpu.memory_space<vmem>>, vector<1x32xf32>
    %27 = vector.broadcast %26 : vector<1x32xf32> to vector<8x32xf32>
    %28 = arith.addf %25, %27 : vector<8x32xf32>
    %c0_9 = arith.constant 0 : index
    %c0_10 = arith.constant 0 : index
    %c0_11 = arith.constant 0 : index
    %29 = vector.load %arg2[%c0_9, %c0_10, %c0_11] : memref<3x4x32xbf16, #tpu.memory_space<vmem>>, vector<1x4x32xbf16>
    %30 = vector.shape_cast %29 : vector<1x4x32xbf16> to vector<4x32xbf16>
    %cst_12 = arith.constant dense<0.000000e+00> : vector<8x32xf32>
    %31 = tpu.matmul %22, %30, %cst_12 {dimension_numbers = #tpu.dot_dimension_numbers<[1], [0], [0], [1], [0, 0, 1, 1], [], []>} : vector<8x4xbf16>, vector<4x32xbf16>, vector<8x32xf32> -> vector<8x32xf32>
    %c1_i32_13 = arith.constant 1 : i32
    %32 = tpu.dynamic_rotate %31 by %c1_i32_13 dim 0 : vector<8x32xf32>, i32 -> vector<8x32xf32>
    %cst_14 = arith.constant 0.000000e+00 : f32
    %33 = vector.shape_cast %18 : vector<8x1xi1> to vector<8x1xi1>
    %34 = vector.broadcast %33 : vector<8x1xi1> to vector<8x32xi1>
    %35 = vector.broadcast %cst_14 : f32 to vector<8x32xf32>
    %36 = arith.select %34, %32, %35 : vector<8x32xi1>, vector<8x32xf32>
    %37 = arith.addf %28, %36 : vector<8x32xf32>
    %c2 = arith.constant 2 : index
    %c0_15 = arith.constant 0 : index
    %c0_16 = arith.constant 0 : index
    %38 = vector.load %arg2[%c2, %c0_15, %c0_16] : memref<3x4x32xbf16, #tpu.memory_space<vmem>>, vector<1x4x32xbf16>
    %39 = vector.shape_cast %38 : vector<1x4x32xbf16> to vector<4x32xbf16>
    %cst_17 = arith.constant dense<0.000000e+00> : vector<8x32xf32>
    %40 = tpu.matmul %22, %39, %cst_17 {dimension_numbers = #tpu.dot_dimension_numbers<[1], [0], [0], [1], [0, 0, 1, 1], [], []>} : vector<8x4xbf16>, vector<4x32xbf16>, vector<8x32xf32> -> vector<8x32xf32>
    %c7_i32_18 = arith.constant 7 : i32
    %41 = tpu.dynamic_rotate %40 by %c7_i32_18 dim 0 : vector<8x32xf32>, i32 -> vector<8x32xf32>
    %cst_19 = arith.constant 0.000000e+00 : f32
    %42 = vector.shape_cast %20 : vector<8x1xi1> to vector<8x1xi1>
    %43 = vector.broadcast %42 : vector<8x1xi1> to vector<8x32xi1>
    %44 = vector.broadcast %cst_19 : f32 to vector<8x32xf32>
    %45 = arith.select %43, %41, %44 : vector<8x32xi1>, vector<8x32xf32>
    %46 = arith.addf %37, %45 : vector<8x32xf32>
    %47 = arith.truncf %46 : vector<8x32xf32> to vector<8x32xbf16>
    %c1_20 = arith.constant 1 : index
    %c0_21 = arith.constant 0 : index
    %c0_22 = arith.constant 0 : index
    %48 = vector.load %arg4[%c1_20, %c0_21, %c0_22] : memref<3x32x64xbf16, #tpu.memory_space<vmem>>, vector<1x32x64xbf16>
    %49 = vector.shape_cast %48 : vector<1x32x64xbf16> to vector<32x64xbf16>
    %cst_23 = arith.constant dense<0.000000e+00> : vector<8x64xf32>
    %50 = tpu.matmul %47, %49, %cst_23 {dimension_numbers = #tpu.dot_dimension_numbers<[1], [0], [0], [1], [0, 0, 1, 1], [], []>} : vector<8x32xbf16>, vector<32x64xbf16>, vector<8x64xf32> -> vector<8x64xf32>
    %c0_24 = arith.constant 0 : index
    %c0_25 = arith.constant 0 : index
    %51 = vector.load %arg5[%c0_24, %c0_25] : memref<1x64xf32, #tpu.memory_space<vmem>>, vector<1x64xf32>
    %52 = vector.broadcast %51 : vector<1x64xf32> to vector<8x64xf32>
    %53 = arith.addf %50, %52 : vector<8x64xf32>
    %c0_26 = arith.constant 0 : index
    %c0_27 = arith.constant 0 : index
    %c0_28 = arith.constant 0 : index
    %54 = vector.load %arg4[%c0_26, %c0_27, %c0_28] : memref<3x32x64xbf16, #tpu.memory_space<vmem>>, vector<1x32x64xbf16>
    %55 = vector.shape_cast %54 : vector<1x32x64xbf16> to vector<32x64xbf16>
    %cst_29 = arith.constant dense<0.000000e+00> : vector<8x64xf32>
    %56 = tpu.matmul %47, %55, %cst_29 {dimension_numbers = #tpu.dot_dimension_numbers<[1], [0], [0], [1], [0, 0, 1, 1], [], []>} : vector<8x32xbf16>, vector<32x64xbf16>, vector<8x64xf32> -> vector<8x64xf32>
    %c1_i32_30 = arith.constant 1 : i32
    %57 = tpu.dynamic_rotate %56 by %c1_i32_30 dim 0 : vector<8x64xf32>, i32 -> vector<8x64xf32>
    %cst_31 = arith.constant 0.000000e+00 : f32
    %58 = vector.shape_cast %18 : vector<8x1xi1> to vector<8x1xi1>
    %59 = vector.broadcast %58 : vector<8x1xi1> to vector<8x64xi1>
    %60 = vector.broadcast %cst_31 : f32 to vector<8x64xf32>
    %61 = arith.select %59, %57, %60 : vector<8x64xi1>, vector<8x64xf32>
    %62 = arith.addf %53, %61 : vector<8x64xf32>
    %c2_32 = arith.constant 2 : index
    %c0_33 = arith.constant 0 : index
    %c0_34 = arith.constant 0 : index
    %63 = vector.load %arg4[%c2_32, %c0_33, %c0_34] : memref<3x32x64xbf16, #tpu.memory_space<vmem>>, vector<1x32x64xbf16>
    %64 = vector.shape_cast %63 : vector<1x32x64xbf16> to vector<32x64xbf16>
    %cst_35 = arith.constant dense<0.000000e+00> : vector<8x64xf32>
    %65 = tpu.matmul %47, %64, %cst_35 {dimension_numbers = #tpu.dot_dimension_numbers<[1], [0], [0], [1], [0, 0, 1, 1], [], []>} : vector<8x32xbf16>, vector<32x64xbf16>, vector<8x64xf32> -> vector<8x64xf32>
    %c7_i32_36 = arith.constant 7 : i32
    %66 = tpu.dynamic_rotate %65 by %c7_i32_36 dim 0 : vector<8x64xf32>, i32 -> vector<8x64xf32>
    %cst_37 = arith.constant 0.000000e+00 : f32
    %67 = vector.shape_cast %20 : vector<8x1xi1> to vector<8x1xi1>
    %68 = vector.broadcast %67 : vector<8x1xi1> to vector<8x64xi1>
    %69 = vector.broadcast %cst_37 : f32 to vector<8x64xf32>
    %70 = arith.select %68, %66, %69 : vector<8x64xi1>, vector<8x64xf32>
    %71 = arith.addf %62, %70 : vector<8x64xf32>
    %72 = arith.truncf %71 : vector<8x64xf32> to vector<8x64xbf16>
    %c1_38 = arith.constant 1 : index
    %c0_39 = arith.constant 0 : index
    %c0_40 = arith.constant 0 : index
    %73 = vector.load %arg6[%c1_38, %c0_39, %c0_40] : memref<3x64x128xbf16, #tpu.memory_space<vmem>>, vector<1x64x128xbf16>
    %74 = vector.shape_cast %73 : vector<1x64x128xbf16> to vector<64x128xbf16>
    %cst_41 = arith.constant dense<0.000000e+00> : vector<8x128xf32>
    %75 = tpu.matmul %72, %74, %cst_41 {dimension_numbers = #tpu.dot_dimension_numbers<[1], [0], [0], [1], [0, 0, 1, 1], [], []>} : vector<8x64xbf16>, vector<64x128xbf16>, vector<8x128xf32> -> vector<8x128xf32>
    %c0_42 = arith.constant 0 : index
    %c0_43 = arith.constant 0 : index
    %76 = vector.load %arg7[%c0_42, %c0_43] : memref<1x128xf32, #tpu.memory_space<vmem>>, vector<1x128xf32>
    %77 = vector.broadcast %76 : vector<1x128xf32> to vector<8x128xf32>
    %78 = arith.addf %75, %77 : vector<8x128xf32>
    %c0_44 = arith.constant 0 : index
    %c0_45 = arith.constant 0 : index
    %c0_46 = arith.constant 0 : index
    %79 = vector.load %arg6[%c0_44, %c0_45, %c0_46] : memref<3x64x128xbf16, #tpu.memory_space<vmem>>, vector<1x64x128xbf16>
    %80 = vector.shape_cast %79 : vector<1x64x128xbf16> to vector<64x128xbf16>
    %cst_47 = arith.constant dense<0.000000e+00> : vector<8x128xf32>
    %81 = tpu.matmul %72, %80, %cst_47 {dimension_numbers = #tpu.dot_dimension_numbers<[1], [0], [0], [1], [0, 0, 1, 1], [], []>} : vector<8x64xbf16>, vector<64x128xbf16>, vector<8x128xf32> -> vector<8x128xf32>
    %c1_i32_48 = arith.constant 1 : i32
    %82 = tpu.dynamic_rotate %81 by %c1_i32_48 dim 0 : vector<8x128xf32>, i32 -> vector<8x128xf32>
    %cst_49 = arith.constant 0.000000e+00 : f32
    %83 = vector.shape_cast %18 : vector<8x1xi1> to vector<8x1xi1>
    %84 = vector.broadcast %83 : vector<8x1xi1> to vector<8x128xi1>
    %85 = vector.broadcast %cst_49 : f32 to vector<8x128xf32>
    %86 = arith.select %84, %82, %85 : vector<8x128xi1>, vector<8x128xf32>
    %87 = arith.addf %78, %86 : vector<8x128xf32>
    %c2_50 = arith.constant 2 : index
    %c0_51 = arith.constant 0 : index
    %c0_52 = arith.constant 0 : index
    %88 = vector.load %arg6[%c2_50, %c0_51, %c0_52] : memref<3x64x128xbf16, #tpu.memory_space<vmem>>, vector<1x64x128xbf16>
    %89 = vector.shape_cast %88 : vector<1x64x128xbf16> to vector<64x128xbf16>
    %cst_53 = arith.constant dense<0.000000e+00> : vector<8x128xf32>
    %90 = tpu.matmul %72, %89, %cst_53 {dimension_numbers = #tpu.dot_dimension_numbers<[1], [0], [0], [1], [0, 0, 1, 1], [], []>} : vector<8x64xbf16>, vector<64x128xbf16>, vector<8x128xf32> -> vector<8x128xf32>
    %c7_i32_54 = arith.constant 7 : i32
    %91 = tpu.dynamic_rotate %90 by %c7_i32_54 dim 0 : vector<8x128xf32>, i32 -> vector<8x128xf32>
    %cst_55 = arith.constant 0.000000e+00 : f32
    %92 = vector.shape_cast %20 : vector<8x1xi1> to vector<8x1xi1>
    %93 = vector.broadcast %92 : vector<8x1xi1> to vector<8x128xi1>
    %94 = vector.broadcast %cst_55 : f32 to vector<8x128xf32>
    %95 = arith.select %93, %91, %94 : vector<8x128xi1>, vector<8x128xf32>
    %96 = arith.addf %87, %95 : vector<8x128xf32>
    %97 = arith.truncf %96 : vector<8x128xf32> to vector<8x128xbf16>
    %c0_56 = arith.constant 0 : index
    %c0_57 = arith.constant 0 : index
    %98 = vector.load %arg8[%c0_56, %c0_57] : memref<128x128xbf16, #tpu.memory_space<vmem>>, vector<128x128xbf16>
    %cst_58 = arith.constant dense<0.000000e+00> : vector<8x128xf32>
    %99 = tpu.matmul %97, %98, %cst_58 {dimension_numbers = #tpu.dot_dimension_numbers<[1], [0], [0], [1], [0, 0, 1, 1], [], []>} : vector<8x128xbf16>, vector<128x128xbf16>, vector<8x128xf32> -> vector<8x128xf32>
    %c0_59 = arith.constant 0 : index
    %c0_60 = arith.constant 0 : index
    %100 = vector.load %arg9[%c0_59, %c0_60] : memref<1x128xf32, #tpu.memory_space<vmem>>, vector<1x128xf32>
    %101 = vector.broadcast %100 : vector<1x128xf32> to vector<8x128xf32>
    %102 = arith.addf %99, %101 : vector<8x128xf32>
    %c0_61 = arith.constant 0 : index
    %c0_62 = arith.constant 0 : index
    %103 = vector.load %arg10[%c0_61, %c0_62] : memref<8x128xf32, #tpu.memory_space<vmem>>, vector<8x128xf32>
    tpu.vector_store %arg10[%c0_61, %c0_62], %102 {strides = array<i32>} : memref<8x128xf32, #tpu.memory_space<vmem>>, vector<8x128xf32>,
    return
  }
  func.func @transform_0(%arg0: i32) -> (i32, i32) {
    %c0_i32 = arith.constant 0 : i32
    %c0_i32_0 = arith.constant 0 : i32
    return %arg0, %c0_i32 : i32, i32
  }
  func.func @transform_1(%arg0: i32) -> (i32, i32, i32) {
    %c0_i32 = arith.constant 0 : i32
    %c0_i32_0 = arith.constant 0 : i32
    %c0_i32_1 = arith.constant 0 : i32
    %c0_i32_2 = arith.constant 0 : i32
    return %c0_i32, %c0_i32_0, %c0_i32_1 : i32, i32, i32
  }
  func.func @transform_2(%arg0: i32) -> (i32, i32) {
    %c0_i32 = arith.constant 0 : i32
    %c0_i32_0 = arith.constant 0 : i32
    %c0_i32_1 = arith.constant 0 : i32
    return %c0_i32, %c0_i32_0 : i32, i32
  }
  func.func @transform_3(%arg0: i32) -> (i32, i32, i32) {
    %c0_i32 = arith.constant 0 : i32
    %c0_i32_0 = arith.constant 0 : i32
    %c0_i32_1 = arith.constant 0 : i32
    %c0_i32_2 = arith.constant 0 : i32
    return %c0_i32, %c0_i32_0, %c0_i32_1 : i32, i32, i32
  }
  func.func @transform_4(%arg0: i32) -> (i32, i32) {
    %c0_i32 = arith.constant 0 : i32
    %c0_i32_0 = arith.constant 0 : i32
    %c0_i32_1 = arith.constant 0 : i32
    return %c0_i32, %c0_i32_0 : i32, i32
  }
  func.func @transform_5(%arg0: i32) -> (i32, i32, i32) {
    %c0_i32 = arith.constant 0 : i32
    %c0_i32_0 = arith.constant 0 : i32
    %c0_i32_1 = arith.constant 0 : i32
    %c0_i32_2 = arith.constant 0 : i32
    return %c0_i32, %c0_i32_0, %c0_i32_1 : i32, i32, i32
  }
  func.func @transform_6(%arg0: i32) -> (i32, i32) {
    %c0_i32 = arith.constant 0 : i32
    %c0_i32_0 = arith.constant 0 : i32
    %c0_i32_1 = arith.constant 0 : i32
    return %c0_i32, %c0_i32_0 : i32, i32
  }
  func.func @transform_7(%arg0: i32) -> (i32, i32) {
    %c0_i32 = arith.constant 0 : i32
    %c0_i32_0 = arith.constant 0 : i32
    %c0_i32_1 = arith.constant 0 : i32
    return %c0_i32, %c0_i32_0 : i32, i32
  }
  func.func @transform_8(%arg0: i32) -> (i32, i32) {
    %c0_i32 = arith.constant 0 : i32
    %c0_i32_0 = arith.constant 0 : i32
    %c0_i32_1 = arith.constant 0 : i32
    return %c0_i32, %c0_i32_0 : i32, i32
  }
  func.func @transform_9(%arg0: i32) -> (i32, i32) {
    %c0_i32 = arith.constant 0 : i32
    %c0_i32_0 = arith.constant 0 : i32
    return %arg0, %c0_i32 : i32, i32
  }
}

</mosaic_0001>

<bundles_post_ra>
// kernel: encoder_cnn_forward.1
= control target key start
LH: loop header
LB: loop body
LE: loop exit
PB: predicated region body
PF: predicated region fallthrough
CT: control target
= control target key end

     0   :  { %s1400_s30 = smov 0   ;;  %s1598_s0 = inlined_call_operand.vmem [shape: f32[16,4], index: 0, kind: input, shape index: {}]   ;;  %s1599_s1 = inlined_call_operand.vmem [shape: bf16[3,4,32], index: 1, kind: input, shape index: {}]   ;;  %s1600_s2 = inlined_call_operand.vmem [shape: f32[1,32], index: 2, kind: input, shape index: {}]   ;;  %s1601_s3 = inlined_call_operand.vmem [shape: bf16[3,32,64], index: 3, kind: input, shape index: {}]   ;;  %s1602_s4 = inlined_call_operand.vmem [shape: f32[1,64], index: 4, kind: input, shape index: {}]   ;;  %s1603_s5 = inlined_call_operand.vmem [shape: bf16[3,64,128], index: 5, kind: input, shape index: {}]   ;;  %s1604_s6 = inlined_call_operand.vmem [shape: f32[1,128], index: 6, kind: input, shape index: {}]   ;;  %s1605_s7 = inlined_call_operand.vmem [shape: bf16[128,128], index: 7, kind: input, shape index: {}]   ;;  %s1606_s8 = inlined_call_operand.vmem [shape: f32[1,128], index: 8, kind: input, shape index: {}]   ;;  %s1607_s9 = inlined_call_operand.vmem [shape: f32[16,128], index: 9, kind: output, shape index: {}]  }
   0x1 LB: > { %s1093_s10 = sadd.s32 4294967295, %s1346_s30   ;;  %p1097_p0 = scmp.ge.s32.totalorder %s1346_s30, 1  ;;  %s1346_s30 = sphi %s1400_s30, %s19_s30  }
   0x2   : > { %p286_p1 = scmp.lt.s32.totalorder %s1346_s30, 3 }
   0x4   : > { %p287_p2 = pnand %p1097_p0, %p286_p1 }
   0x5   : > { %v1100_v0 = vld [vmem:[%s1599_s1 + $0x2] sm:$0x3] (!%p287_p2)  ;;  %vm360_vm0 = vcmask (!%p287_p2), 1041408   ;;  %v404_v1 = vld [vmem:[%s1599_s1] sm:$0x3] (!%p287_p2)  ;;  %v1348_v2 = vmov (!%p287_p2), 0.0   ;;  %v329_v13 = vlaneseq (!%p287_p2) }
   0x6   : > { %290 = sbr.rel (%p287_p2) target bundleno = 925 (0x39d), region = 56  ;;  %1206 = vmatprep.subr.bf16.mxu0 (!%p287_p2), %v1348_v2  ;;  %v362_v3 = vsel (!%p287_p2), %vm360_vm0, %v1100_v0, 0  ;;  %1212 = vmatprep.subr.bf16.mxu1 (!%p287_p2), %v1348_v2  ;;  %v406_v4 = vsel (!%p287_p2), %vm360_vm0, %v404_v1, 0  ;;  %p320_p3 = scmp.lt.s32.totalorder (!%p287_p2), %s1093_s10, 1  ;;  %v1104_v5 = vld [vmem:[%s1599_s1 + $0x4] sm:$0x3] (!%p287_p2) }
   0x7   : > { %1207 = vmatpush3.bf16.msra.mxu0 (!%p287_p2), %v362_v3  ;;  %1213 = vmatpush3.bf16.msra.mxu1 (!%p287_p2), %v406_v4  ;;  %vm1349_vm1 = vmmov (!%p287_p2), 0   ;;  %vm356_vm2 = vcmask (!%p287_p2), 31744   ;;  %v456_v7 = vsel (!%p287_p2), %vm360_vm0, %v1104_v5, 0  ;;  %v1314_v9 = vld [vmem:[%s1601_s3 + $0x10] sm:$0xff] (!%p287_p2)   ;;  %v1315_v10 = vld [vmem:[%s1601_s3 + $0x20] sm:$0xff] (!%p287_p2)   ;;  %v1316_v11 = vld [vmem:[%s1601_s3 + $0x18] sm:$0xff] (!%p287_p2)  }
   0x8   : > { %1208 = vmatprep.mubr.msk.bf16.mxu0 (!%p287_p2), %vm1349_vm1, %v1348_v2  ;;  %1214 = vmatprep.mubr.msk.bf16.mxu1 (!%p287_p2), %vm1349_vm1, %v1348_v2  ;;  %v1317_v12 = vld [vmem:[%s1601_s3 + $0x28] sm:$0xff] (!%p287_p2)   ;;  %v330_v14 = vshrl.u32 (!%p287_p2), %v329_v13, 7  ;;  %v1101_v16 = vld [vmem:[%s1600_s2] ss:$0 sm:$0xff] (!%p287_p2)  ;;  %vm528_vm5 = vcmask (!%p287_p2), 261120   ;;  %v1324_v45 = vld [vmem:[%s1603_s5 + $0x30] sm:$0xff] (!%p287_p2)  }
   0x9   : > { %1218 = vmatprep.subr.bf16.mxu0 (!%p287_p2), %v1348_v2  ;;  %1240 = vmatprep.subr.bf16.mxu1 (!%p287_p2), %v1348_v2  ;;  %v1318_v38 = vld [vmem:[%s1601_s3] sm:$0xff] (!%p287_p2)   ;;  %v1319_v40 = vld [vmem:[%s1601_s3 + $0x8] sm:$0xff] (!%p287_p2)   ;;  %v1325_v46 = vld [vmem:[%s1603_s5 + $0x10] sm:$0xff] (!%p287_p2)   ;;  %vm732_vm6 = vcmask (!%p287_p2), 523264  }
   0xa   : > { %v335_v15 = vand.u32 (!%p287_p2), 7, %v330_v14  ;;  %v1320_v41 = vld [vmem:[%s1603_s5 + $0x20] sm:$0xff] (!%p287_p2)   ;;  %v1322_v43 = vld [vmem:[%s1603_s5 + $0x28] sm:$0xff] (!%p287_p2)   ;;  %v1326_v47 = vld [vmem:[%s1603_s5 + $0x38] sm:$0xff] (!%p287_p2)  }
   0xb   : > { %v1321_v42 = vld [vmem:[%s1603_s5] sm:$0xff] (!%p287_p2)   ;;  %v1323_v44 = vld [vmem:[%s1603_s5 + $0x8] sm:$0xff] (!%p287_p2)   ;;  %v1327_v48 = vld [vmem:[%s1603_s5 + $0x18] sm:$0xff] (!%p287_p2)  }
   0xc   : > { %vm1462_vm3 = vcmp.ne.s32.totalorder (!%p287_p2), %v335_v15, 0  ;;  %vm1468_vm4 = vcmp.ne.s32.totalorder (!%p287_p2), %v335_v15, 7  ;;  %v1110_v57 = vld [vmem:[%s1602_s4] ss:$0 sm:$0xff] (!%p287_p2)  ;;  %v1334_v13 = vld [vmem:[%s1605_s7 + $0x10] sm:$0xff] (!%p287_p2)   ;;  %v1335_v14 = vld [vmem:[%s1605_s7 + $0x18] sm:$0xff] (!%p287_p2)  }
   0xd   : > { %s1613_s10 = smov (!%p320_p3, %s1093_s10), 1  ;;  %v1336_v15 = vld [vmem:[%s1605_s7 + $0x20] sm:$0xff]  }
   0xe   : > { %s1098_s17 = sshll.u32 %s1613_s10, 3 }
   0xf   : > { %s323_s20 = scalar_lea.vmem %s1598_s0, %s1098_s17  ;;  %s327_s29 = scalar_lea.vmem %s1607_s9, %s1098_s17 }
  0x10   : > { %v345_v6 = vld [vmem:[%s323_s20] sm:$0xff] }
  0x11   : > { %v346_v8 = vpack.c.bf16 %v345_v6, %v345_v6  ;;  %v1328_v6 = vld [vmem:[%s1603_s5 + $0x40] sm:$0xff]  }
  0x13   : > { %1209 = vmatmul.mubr.msk.bf16.vlgmr.msra.gmra.mrb[0].mxu0 %vm356_vm2, %v346_v8  ;;  %1215 = vmatmul.mubr.msk.bf16.vlgmr.msra.gmra.mrb[0].mxu1 %vm356_vm2, %v346_v8 }
  0x14   : > { %1219 = vmatpush3.bf16.msra.mxu0 %v456_v7  ;;  %1220 = vmatprep.mubr.msk.bf16.mxu0 %vm1349_vm1, %v1348_v2 }
  0x15   : > { %1224 = vmatprep.subr.bf16.mxu0 %v1348_v2  ;;  %1244 = vmatprep.mubr.msk.bf16.mxu1 %vm1349_vm1, %v1348_v2 }
  0x16   : > { %1241 = vmatpush3.bf16.msra.mxu1 %v1315_v10  ;;  %v1333_v10 = vld [vmem:[%s1605_s7 + $0x8] sm:$0xff]  }
  0x17   : > { %1242 = vmatprep.subr.bf16.mxu1 %v1348_v2 }
  0x1a   : > { %1243 = vmatpush3.bf16.msra.mxu1 %v1317_v12  ;;  %v1331_v12 = vld [vmem:[%s1603_s5 + $0x58] sm:$0xff]  }
  0x1b   : > { %1221 = vmatmul.mubr.msk.bf16.vlgmr.msra.gmra.mrb[4].mxu0 %vm356_vm2, %v346_v8  ;;  %1260 = vmatprep.subr.bf16.mxu1 %v1348_v2  ;;  %v1332_v8 = vld [vmem:[%s1605_s7] sm:$0xff]  }
  0x1c   : > { %1228 = vmatprep.mubr.msk.bf16.mxu0 %vm1349_vm1, %v1348_v2  ;;  %1225 = vmatpush3.bf16.msra.mxu0 %v1314_v9  ;;  %v1329_v9 = vld [vmem:[%s1603_s5 + $0x48] sm:$0xff]  }
  0x1d   : > { %1226 = vmatprep.subr.bf16.mxu0 %v1348_v2 }
  0x20   : > { %1227 = vmatpush3.bf16.msra.mxu0 %v1316_v11  ;;  %v1330_v11 = vld [vmem:[%s1603_s5 + $0x50] sm:$0xff]  }
  0x21   : > { %1232 = vmatprep.subr.bf16.mxu0 %v1348_v2 }
  0xe6   : > { %v398_v17 = vpop.f32.mrb[0].mxu0  ;;  %v442_v19 = vpop.f32.mrb[0].mxu1 }
  0xe7   : > { %v399_v20 = vadd.f32 %v1101_v16, %v398_v17  ;;  %v448_v21 = vrot.slane %v442_v19, 7  ;;  %v1210_v22 = vpop.f32.mrb[1].mxu0  ;;  %v1216_v23 = vpop.f32.mrb[1].mxu1  ;;  %v1337_v16 = vld [vmem:[%s1605_s7 + $0x28] sm:$0xff]   ;;  %v1338_v17 = vld [vmem:[%s1605_s7 + $0x30] sm:$0xff]   ;;  %v1339_v19 = vld [vmem:[%s1605_s7 + $0x38] sm:$0xff]  }
  0xe8   : > { %v401_v24 = vpop.f32.mrb[2].mxu0  ;;  %v445_v25 = vpop.f32.mrb[2].mxu1 }
  0xe9   : > { %v451_v26 = vsel %vm1462_vm3, %v448_v21, 0.0  ;;  %v1211_v27 = vpop.f32.mrb[3].mxu0  ;;  %v1217_v28 = vpop.f32.mrb[3].mxu1 }
  0xea   : > { %v452_v29 = vadd.f32 %v451_v26, %v399_v20  ;;  %v1132_v20 = vld [vmem:[%s1604_s6] ss:$0 sm:$0xff] }
  0xee   : > { %v492_v31 = vpop.f32.mrb[4].mxu0 }
  0xef   : > { %v498_v32 = vrot.slane %v492_v31, 1  ;;  %v1222_v33 = vpop.f32.mrb[5].mxu0 }
  0xf0   : > { %v495_v34 = vpop.f32.mrb[6].mxu0 }
  0xf1   : > { %v501_v35 = vsel %vm1468_vm4, %v498_v32, 0.0  ;;  %v1223_v36 = vpop.f32.mrb[7].mxu0 }
  0xf2   : > { %v502_v37 = vadd.f32 %v501_v35, %v452_v29 }
  0xf4   : > { %v503_v39 = vpack.c.bf16 %v502_v37, %v502_v37 }
  0xf6   : > { %1229 = vmatmul.mubr.msk.bf16.vlgmr.msra.gmra.mrb[8].mxu0 %vm528_vm5, %v503_v39  ;;  %1245 = vmatmul.mubr.msk.bf16.vlgmr.msra.gmra.mrb[4].mxu1 %vm528_vm5, %v503_v39 }
  0xf7   : > { %1233 = vmatpush3.bf16.msra.mxu0 %v1318_v38  ;;  %1236 = vmatprep.mubr.msk.bf16.mxu0 %vm1349_vm1, %v1348_v2 }
  0xf8   : > { %1234 = vmatprep.subr.bf16.mxu0 %v1348_v2  ;;  %1268 = vmatprep.mubr.msk.bf16.mxu1 %vm1349_vm1, %v1348_v2 }
  0xf9   : > { %1261 = vmatpush3.bf16.msra.mxu1 %v1321_v42 }
  0xfa   : > { %1262 = vmatprep.subr.bf16.mxu1 %v1348_v2 }
  0xfb   : > { %1235 = vmatpush3.bf16.msra.mxu0 %v1319_v40 }
  0xfc   : > { %1248 = vmatprep.subr.bf16.mxu0 %v1348_v2 }
  0xfd   : > { %1263 = vmatpush3.bf16.msra.mxu1 %v1323_v44 }
  0xfe   : > { %1237 = vmatmul.mubr.msk.bf16.vlgmr.msra.gmra.mrb[12].mxu0 %vm528_vm5, %v503_v39  ;;  %1264 = vmatprep.subr.bf16.mxu1 %v1348_v2 }
  0xff   : > { %1256 = vmatprep.mubr.msk.bf16.mxu0 %vm1349_vm1, %v1348_v2  ;;  %1249 = vmatpush3.bf16.msra.mxu0 %v1320_v41  ;;  %v1156_v41 = vld [vmem:[%s1606_s8] ss:$0 sm:$0xff] }
 0x100   : > { %1250 = vmatprep.subr.bf16.mxu0 %v1348_v2 }
 0x101   : > { %1265 = vmatpush3.bf16.msra.mxu1 %v1325_v46 }
 0x102   : > { %1266 = vmatprep.subr.bf16.mxu1 %v1348_v2 }
 0x103   : > { %1251 = vmatpush3.bf16.msra.mxu0 %v1322_v43 }
 0x104   : > { %1252 = vmatprep.subr.bf16.mxu0 %v1348_v2 }
 0x105   : > { %1267 = vmatpush3.bf16.msra.mxu1 %v1327_v48 }
 0x106   : > { %1284 = vmatprep.subr.bf16.mxu1 %v1348_v2 }
 0x107   : > { %1253 = vmatpush3.bf16.msra.mxu0 %v1324_v45 }
 0x108   : > { %1254 = vmatprep.subr.bf16.mxu0 %v1348_v2 }
 0x10b   : > { %1255 = vmatpush3.bf16.msra.mxu0 %v1326_v47 }
 0x10c   : > { %1272 = vmatprep.subr.bf16.mxu0 %v1348_v2 }
 0x1c9   : > { %v566_v49 = vpop.f32.mrb[8].mxu0  ;;  %v682_v50 = vpop.f32.mrb[4].mxu1 }
 0x1ca   : > { %v1230_v51 = vpop.f32.mrb[9].mxu0  ;;  %v1246_v52 = vpop.f32.mrb[5].mxu1  ;;  %v688_v59 = vrot.slane %v682_v50, 1  ;;  %v567_v62 = vadd.f32 %v1110_v57, %v566_v49 }
 0x1cb   : > { %v569_v53 = vpop.f32.mrb[10].mxu0  ;;  %v685_v54 = vpop.f32.mrb[6].mxu1 }
 0x1cc   : > { %v1231_v55 = vpop.f32.mrb[11].mxu0  ;;  %v1247_v56 = vpop.f32.mrb[7].mxu1  ;;  %v689_v4 = vsel %vm1468_vm4, %v688_v59, 0.0 }
 0x1d1   : > { %v622_v58 = vpop.f32.mrb[12].mxu0 }
 0x1d2   : > { %v628_v60 = vrot.slane %v622_v58, 7  ;;  %v1238_v61 = vpop.f32.mrb[13].mxu0 }
 0x1d3   : > { %v625_v63 = vpop.f32.mrb[14].mxu0 }
 0x1d4   : > { %v629_v0 = vsel %vm1462_vm3, %v628_v60, 0.0  ;;  %v1239_v1 = vpop.f32.mrb[15].mxu0 }
 0x1d5   : > { %v630_v3 = vadd.f32 %v629_v0, %v567_v62 }
 0x1d7   : > { %v690_v5 = vadd.f32 %v689_v4, %v630_v3 }
 0x1d9   : > { %v691_v7 = vpack.c.bf16 %v690_v5, %v690_v5 }
 0x1db   : > { %1257 = vmatmul.mubr.msk.bf16.vlgmr.msra.gmra.mrb[16].mxu0 %vm732_vm6, %v691_v7  ;;  %1269 = vmatmul.mubr.msk.bf16.vlgmr.msra.gmra.mrb[8].mxu1 %vm732_vm6, %v691_v7 }
 0x1dc   : > { %1273 = vmatpush3.bf16.msra.mxu0 %v1328_v6  ;;  %1280 = vmatprep.mubr.msk.bf16.mxu0 %vm1349_vm1, %v1348_v2 }
 0x1dd   : > { %1274 = vmatprep.subr.bf16.mxu0 %v1348_v2  ;;  %1285 = vmatpush3.bf16.msra.mxu1 %v1332_v8 }
 0x1de   : > { %1286 = vmatprep.subr.bf16.mxu1 %v1348_v2  ;;  %1300 = vmatprep.mubr.msk.bf16.mxu1 %vm1349_vm1, %v1348_v2 }
 0x1e0   : > { %1275 = vmatpush3.bf16.msra.mxu0 %v1329_v9 }
 0x1e1   : > { %1276 = vmatprep.subr.bf16.mxu0 %v1348_v2  ;;  %1287 = vmatpush3.bf16.msra.mxu1 %v1333_v10 }
 0x1e2   : > { %1288 = vmatprep.subr.bf16.mxu1 %v1348_v2 }
 0x1e4   : > { %1277 = vmatpush3.bf16.msra.mxu0 %v1330_v11 }
 0x1e5   : > { %1278 = vmatprep.subr.bf16.mxu0 %v1348_v2  ;;  %1289 = vmatpush3.bf16.msra.mxu1 %v1334_v13 }
 0x1e6   : > { %1290 = vmatprep.subr.bf16.mxu1 %v1348_v2 }
 0x1e8   : > { %1279 = vmatpush3.bf16.msra.mxu0 %v1331_v12 }
 0x1e9   : > { %1291 = vmatpush3.bf16.msra.mxu1 %v1335_v14 }
 0x1ea   : > { %1292 = vmatprep.subr.bf16.mxu1 %v1348_v2 }
 0x1eb   : > { %1281 = vmatmul.mubr.msk.bf16.vlgmr.msra.gmra.mrb[20].mxu0 %vm732_vm6, %v691_v7 }
 0x1ed   : > { %1293 = vmatpush3.bf16.msra.mxu1 %v1336_v15 }
 0x1ee   : > { %1294 = vmatprep.subr.bf16.mxu1 %v1348_v2 }
 0x1f1   : > { %1295 = vmatpush3.bf16.msra.mxu1 %v1337_v16 }
 0x1f2   : > { %1296 = vmatprep.subr.bf16.mxu1 %v1348_v2 }
 0x1f5   : > { %1297 = vmatpush3.bf16.msra.mxu1 %v1338_v17 }
 0x1f6   : > { %1298 = vmatprep.subr.bf16.mxu1 %v1348_v2 }
 0x1f9   : > { %1299 = vmatpush3.bf16.msra.mxu1 %v1339_v19 }
 0x2ae   : > { %v770_v21 = vpop.f32.mrb[16].mxu0  ;;  %v842_v22 = vpop.f32.mrb[8].mxu1 }
 0x2af   : > { %v771_v23 = vadd.f32 %v1132_v20, %v770_v21  ;;  %v848_v24 = vrot.slane %v842_v22, 7  ;;  %v1258_v25 = vpop.f32.mrb[17].mxu0  ;;  %v1270_v26 = vpop.f32.mrb[9].mxu1 }
 0x2b0   : > { %v773_v27 = vpop.f32.mrb[18].mxu0  ;;  %v845_v28 = vpop.f32.mrb[10].mxu1 }
 0x2b1   : > { %v849_v2 = vsel %vm1462_vm3, %v848_v24, 0.0  ;;  %v1259_v29 = vpop.f32.mrb[19].mxu0  ;;  %v1271_v31 = vpop.f32.mrb[11].mxu1 }
 0x2b2   : > { %v850_v32 = vadd.f32 %v849_v2, %v771_v23 }
 0x2be   : > { %v918_v33 = vpop.f32.mrb[20].mxu0 }
 0x2bf   : > { %v924_v34 = vrot.slane %v918_v33, 1  ;;  %v1282_v35 = vpop.f32.mrb[21].mxu0 }
 0x2c0   : > { %v921_v36 = vpop.f32.mrb[22].mxu0 }
 0x2c1   : > { %v925_v37 = vsel %vm1468_vm4, %v924_v34, 0.0  ;;  %v1283_v38 = vpop.f32.mrb[23].mxu0 }
 0x2c2   : > { %v926_v39 = vadd.f32 %v925_v37, %v850_v32 }
 0x2c4   : > { %v927_v40 = vpack.c.bf16 %v926_v39, %v926_v39 }
 0x2c6   : > { %1301 = vmatmul.mubr.bf16.vlgmr.msra.gmra.mrb[12].mxu1 %v927_v40 }
 0x399   : > { %v1033_v18 = vpop.f32.mrb[12].mxu1 }
 0x39a   : > { %v1034_v42 = vadd.f32 %v1156_v41, %v1033_v18  ;;  %v1302_v43 = vpop.f32.mrb[13].mxu1 }
 0x39b   : > { %v1036_v44 = vpop.f32.mrb[14].mxu1 }
 0x39c   : > { %1039 = vst [vmem:[%s327_s29] sm:$0xff] %v1034_v42  ;;  %v1303_v30 = vpop.f32.mrb[15].mxu1 }
 0x39d PF: > { %s19_s30 = sadd.s32 1, %s1346_s30  }
 0x39e   : > { %p16_p4 = scmp.ge.s32.totalorder %s19_s30, 4  }
 0x3a0   :  { %18 = sbr.rel (!%p16_p4) target bundleno = 1 (0x1), region = 92 }

</bundles_post_ra>
